<compile_context>
chip_gen: v6e
topology: v6e:2x2x1
jax: 0.10.0
libtpu: 0.0.40
codegen_flags: <defaults>
</compile_context>

<pallas_src>
import jax
import jax.numpy as jnp
import numpy as np
from jax.experimental import pallas as pl
from jax.experimental.pallas import tpu as pltpu

_LANES = 128
_SUBLANES = 8
_MAX_TILE_ROWS = 4096                      # 4096*128*4B = 2 MiB per f32 input block
_MIN_PALLAS_ELEMS = _SUBLANES * _LANES     # below one (8,128) tile: plain XLA is cheaper


def _round_up(x: int, m: int) -> int:
    return (x + m - 1) // m * m


def _sse_partial_kernel(pred_ref, lab_ref, out_ref):
    """Per-grid-block partial sum of squared errors.

    pred_ref / lab_ref : (tile_rows, 128) lane-dense blocks.
    out_ref            : (8, 128) per-block partial accumulator.

    The in-block reduction collapses the leading axis only (adds of whole
    vregs on the VPU); no cross-lane/cross-sublane XLU reduce runs here.
    """
    d = pred_ref[...].astype(jnp.float32) - lab_ref[...].astype(jnp.float32)
    sq = d * d
    tile_rows = sq.shape[0]
    out_ref[...] = jnp.sum(
        sq.reshape(tile_rows // _SUBLANES, _SUBLANES, _LANES), axis=0
    )


def _sse_pallas(pred: jax.Array, lab: jax.Array) -> jax.Array:
    """Sum of squared errors between pred and lab (same shape) via Pallas."""
    n = pred.size
    pred_flat = pred.reshape(-1)
    lab_flat = lab.reshape(-1)

    rows_needed = -(-n // _LANES)
    tile_rows = min(_round_up(rows_needed, _SUBLANES), _MAX_TILE_ROWS)
    total_rows = _round_up(rows_needed, tile_rows)
    padded_n = total_rows * _LANES
    if padded_n != n:
        # Zero padding on both operands -> zero difference -> contributes 0.
        pad = padded_n - n
        pred_flat = jnp.pad(pred_flat, (0, pad))
        lab_flat = jnp.pad(lab_flat, (0, pad))

    pred2d = pred_flat.reshape(total_rows, _LANES)
    lab2d = lab_flat.reshape(total_rows, _LANES)
    num_blocks = total_rows // tile_rows

    block_bytes = tile_rows * _LANES * pred2d.dtype.itemsize
    # 2 inputs x 2 pipeline buffers + elementwise intermediates + headroom;
    # capped well below v7x's 64 MiB physical VMEM.
    vmem_limit = min(4 * block_bytes + (16 << 20), 48 << 20)

    partials = pl.pallas_call(
        _sse_partial_kernel,
        out_shape=jax.ShapeDtypeStruct((num_blocks * _SUBLANES, _LANES), jnp.float32),
        grid_spec=pltpu.PrefetchScalarGridSpec(
            num_scalar_prefetch=0,
            grid=(num_blocks,),
            in_specs=[
                pl.BlockSpec((tile_rows, _LANES), lambda b: (b, 0)),
                pl.BlockSpec((tile_rows, _LANES), lambda b: (b, 0)),
            ],
            out_specs=pl.BlockSpec((_SUBLANES, _LANES), lambda b: (b, 0)),
        ),
        compiler_params=pltpu.CompilerParams(
            dimension_semantics=("parallel",),  # independent per-block partials
            vmem_limit_bytes=vmem_limit,
        ),
    )(pred2d, lab2d)
    return jnp.sum(partials)


def _sse(pred: jax.Array, lab: jax.Array) -> jax.Array:
    """Sum of squared errors; tiny tensors skip the Pallas launch overhead."""
    if pred.size < _MIN_PALLAS_ELEMS:
        d = pred.astype(jnp.float32) - lab.astype(jnp.float32)
        return jnp.sum(d * d)
    return _sse_pallas(pred, lab)


def _nearest_exact_downsample(labels: jax.Array, out_hw) -> jax.Array:
    """torch.nn.functional.interpolate(..., mode='nearest-exact') for integer factors.

    src_idx = floor((dst + 0.5) * (in/out)) == dst*f + f//2 for integer factor f.
    """
    H, W = labels.shape[2], labels.shape[3]
    Ho, Wo = out_hw
    assert H % Ho == 0 and W % Wo == 0, "nearest-exact path requires integer factors"
    fh, fw = H // Ho, W // Wo
    # TODO(synk): fold this strided selection into the kernel's label loads to
    # avoid materializing the downsampled label tensors in HBM.
    return labels[:, :, fh // 2 :: fh, fw // 2 :: fw]


def multi_scale_mse_loss(outputs, labels):
    """MultiScaleLoss(nn.MSELoss()) forward pass."""
    n = len(outputs)
    if n > 1:
        scale_factors = 2.0 ** (-np.arange(n, dtype=np.float32))
        loss_weights = scale_factors / scale_factors.sum()
    else:
        loss_weights = np.ones((1,), np.float32)

    loss = jnp.float32(0.0)
    for i, out in enumerate(outputs):
        lab_i = labels if i == 0 else _nearest_exact_downsample(labels, out.shape[2:])
        sse = _sse(out, lab_i)
        # MSELoss mean reduction, folded with the scale weight.
        loss = loss + sse * (float(loss_weights[i]) / out.size)
    return loss


def _reference_loss(outputs, labels):
    n = len(outputs)
    sf = 2.0 ** (-np.arange(n, dtype=np.float32))
    w = sf / sf.sum() if n > 1 else np.ones((1,), np.float32)
    total = jnp.float32(0.0)
    for i, out in enumerate(outputs):
        lab_i = labels if i == 0 else _nearest_exact_downsample(labels, out.shape[2:])
        total = total + jnp.mean((out - lab_i) ** 2) * w[i]
    return total


if __name__ == "__main__":
    key = jax.random.PRNGKey(0)
    k0, k1, k2, kl, ka, kb = jax.random.split(key, 6)

    B, C, H, W = 2, 4, 32, 32
    # Ground-truth segmentation masks as one-hot, NCHW.
    label_idx = jax.random.randint(kl, (B, H, W), 0, C)
    labels = jnp.transpose(jax.nn.one_hot(label_idx, C, dtype=jnp.float32), (0, 3, 1, 2))

    # Multi-scale predictions (deep-supervision heads): full, 1/2, 1/4 resolution.
    outputs = [
        jax.random.normal(k0, (B, C, H, W), jnp.float32),
        jax.random.normal(k1, (B, C, H // 2, W // 2), jnp.float32),
        jax.random.normal(k2, (B, C, H // 4, W // 4), jnp.float32),
    ]

    loss_fn = jax.jit(multi_scale_mse_loss)
    loss = loss_fn(outputs, labels)
    jax.block_until_ready(loss)

    ref = _reference_loss(outputs, labels)
    assert np.allclose(np.asarray(loss), np.asarray(ref), rtol=1e-5, atol=1e-5), (
        float(loss),
        float(ref),
    )

    # Extra check: multi-block grid + lane/row zero-padding path of the kernel.
    ta = jax.random.normal(ka, (1, 1, 700, 1000), jnp.float32)
    tb = jax.random.normal(kb, (1, 1, 700, 1000), jnp.float32)
    sse = _sse_pallas(ta, tb)
    jax.block_until_ready(sse)
    ref_sse = jnp.sum((ta - tb) ** 2)
    assert np.allclose(np.asarray(sse), np.asarray(ref_sse), rtol=2e-4), (
        float(sse),
        float(ref_sse),
    )

    print("KERNEL_OK")
</pallas_src>

<mosaic_0001>
module attributes {stable_mosaic.version = 11 : i64} {
  func.func @_sse_partial_kernel(%arg0: i32, %arg1: memref<16x128xf32, #tpu.memory_space<vmem>>, %arg2: memref<16x128xf32, #tpu.memory_space<vmem>>, %arg3: memref<8x128xf32, #tpu.memory_space<vmem>>) attributes {dimension_semantics = [#tpu.dimension_semantics<parallel>], iteration_bounds = array<i64: 1>, scalar_prefetch = 0 : i64, scratch_operands = 0 : i64, tpu.core_type = #tpu.core_type<tc>, window_params = [{transform_indices = @transform_0, window_bounds = array<i64: 16, 128>}, {transform_indices = @transform_1, window_bounds = array<i64: 16, 128>}, {transform_indices = @transform_2, window_bounds = array<i64: 8, 128>}]} {
    %c0 = arith.constant 0 : index
    %c0_0 = arith.constant 0 : index
    %0 = vector.load %arg1[%c0, %c0_0] : memref<16x128xf32, #tpu.memory_space<vmem>>, vector<16x128xf32>
    %c0_1 = arith.constant 0 : index
    %c0_2 = arith.constant 0 : index
    %1 = vector.load %arg2[%c0_1, %c0_2] : memref<16x128xf32, #tpu.memory_space<vmem>>, vector<16x128xf32>
    %2 = arith.subf %0, %1 : vector<16x128xf32>
    %3 = arith.mulf %2, %2 : vector<16x128xf32>
    %4 = vector.shape_cast %3 : vector<16x128xf32> to vector<2x8x128xf32>
    %cst = arith.constant dense<0.000000e+00> : vector<8x128xf32>
    %5 = vector.multi_reduction <add>, %4, %cst [0] : vector<2x8x128xf32> to vector<8x128xf32>
    %c0_3 = arith.constant 0 : index
    %c0_4 = arith.constant 0 : index
    %6 = vector.load %arg3[%c0_3, %c0_4] : memref<8x128xf32, #tpu.memory_space<vmem>>, vector<8x128xf32>
    tpu.vector_store %arg3[%c0_3, %c0_4], %5 {strides = array<i32>} : memref<8x128xf32, #tpu.memory_space<vmem>>, vector<8x128xf32>,
    return
  }
  func.func @transform_0(%arg0: i32) -> (i32, i32) {
    %c0_i32 = arith.constant 0 : i32
    %c0_i32_0 = arith.constant 0 : i32
    return %arg0, %c0_i32 : i32, i32
  }
  func.func @transform_1(%arg0: i32) -> (i32, i32) {
    %c0_i32 = arith.constant 0 : i32
    %c0_i32_0 = arith.constant 0 : i32
    return %arg0, %c0_i32 : i32, i32
  }
  func.func @transform_2(%arg0: i32) -> (i32, i32) {
    %c0_i32 = arith.constant 0 : i32
    %c0_i32_0 = arith.constant 0 : i32
    return %arg0, %c0_i32 : i32, i32
  }
}

module attributes {stable_mosaic.version = 11 : i64} {
  func.func @_sse_partial_kernel(%arg0: i32, %arg1: memref<64x128xf32, #tpu.memory_space<vmem>>, %arg2: memref<64x128xf32, #tpu.memory_space<vmem>>, %arg3: memref<8x128xf32, #tpu.memory_space<vmem>>) attributes {dimension_semantics = [#tpu.dimension_semantics<parallel>], iteration_bounds = array<i64: 1>, scalar_prefetch = 0 : i64, scratch_operands = 0 : i64, tpu.core_type = #tpu.core_type<tc>, window_params = [{transform_indices = @transform_0, window_bounds = array<i64: 64, 128>}, {transform_indices = @transform_1, window_bounds = array<i64: 64, 128>}, {transform_indices = @transform_2, window_bounds = array<i64: 8, 128>}]} {
    %c0 = arith.constant 0 : index
    %c0_0 = arith.constant 0 : index
    %0 = vector.load %arg1[%c0, %c0_0] : memref<64x128xf32, #tpu.memory_space<vmem>>, vector<64x128xf32>
    %c0_1 = arith.constant 0 : index
    %c0_2 = arith.constant 0 : index
    %1 = vector.load %arg2[%c0_1, %c0_2] : memref<64x128xf32, #tpu.memory_space<vmem>>, vector<64x128xf32>
    %2 = arith.subf %0, %1 : vector<64x128xf32>
    %3 = arith.mulf %2, %2 : vector<64x128xf32>
    %4 = vector.shape_cast %3 : vector<64x128xf32> to vector<8x8x128xf32>
    %cst = arith.constant dense<0.000000e+00> : vector<8x128xf32>
    %5 = vector.multi_reduction <add>, %4, %cst [0] : vector<8x8x128xf32> to vector<8x128xf32>
    %c0_3 = arith.constant 0 : index
    %c0_4 = arith.constant 0 : index
    %6 = vector.load %arg3[%c0_3, %c0_4] : memref<8x128xf32, #tpu.memory_space<vmem>>, vector<8x128xf32>
    tpu.vector_store %arg3[%c0_3, %c0_4], %5 {strides = array<i32>} : memref<8x128xf32, #tpu.memory_space<vmem>>, vector<8x128xf32>,
    return
  }
  func.func @transform_0(%arg0: i32) -> (i32, i32) {
    %c0_i32 = arith.constant 0 : i32
    %c0_i32_0 = arith.constant 0 : i32
    return %arg0, %c0_i32 : i32, i32
  }
  func.func @transform_1(%arg0: i32) -> (i32, i32) {
    %c0_i32 = arith.constant 0 : i32
    %c0_i32_0 = arith.constant 0 : i32
    return %arg0, %c0_i32 : i32, i32
  }
  func.func @transform_2(%arg0: i32) -> (i32, i32) {
    %c0_i32 = arith.constant 0 : i32
    %c0_i32_0 = arith.constant 0 : i32
    return %arg0, %c0_i32 : i32, i32
  }
}

</mosaic_0001>

<bundles_post_ra>
// kernel: multi_scale_mse_loss.3
= control target key start
LH: loop header
LB: loop body
LE: loop exit
PB: predicated region body
PF: predicated region fallthrough
CT: control target
= control target key end

     0   :  { %s55_s0 = inlined_call_operand.vmem [shape: f32[16,128], index: 0, kind: input, shape index: {}]   ;;  %s56_s1 = inlined_call_operand.vmem [shape: f32[16,128], index: 1, kind: input, shape index: {}]   ;;  %s57_s2 = inlined_call_operand.vmem [shape: f32[8,128], index: 2, kind: output, shape index: {}]  }
   0x1   :  { %v11_v0 = vld [vmem:[%s55_s0] sm:$0xff]  ;;  %v12_v1 = vld [vmem:[%s55_s0 + $0x8] sm:$0xff] }
   0x2   :  { %v13_v2 = vld [vmem:[%s56_s1] sm:$0xff]  ;;  %v14_v3 = vld [vmem:[%s56_s1 + $0x8] sm:$0xff] }
   0x3   :  { %v15_v4 = vsub.f32 %v11_v0, %v13_v2  ;;  %v16_v5 = vsub.f32 %v12_v1, %v14_v3 }
   0x5   :  { %v17_v6 = vmul.f32 %v15_v4, %v15_v4  ;;  %v18_v7 = vmul.f32 %v16_v5, %v16_v5 }
   0x7   :  { %v19_v8 = vadd.f32 %v18_v7, %v17_v6 }
   0x9   :  { %20 = vst [vmem:[%s57_s2] sm:$0xff] %v19_v8 }

// kernel: multi_scale_mse_loss.2
= control target key start
LH: loop header
LB: loop body
LE: loop exit
PB: predicated region body
PF: predicated region fallthrough
CT: control target
= control target key end

     0   :  { %s121_s0 = inlined_call_operand.vmem [shape: f32[64,128], index: 0, kind: input, shape index: {}]   ;;  %s122_s1 = inlined_call_operand.vmem [shape: f32[64,128], index: 1, kind: input, shape index: {}]   ;;  %s123_s2 = inlined_call_operand.vmem [shape: f32[8,128], index: 2, kind: output, shape index: {}]  }
   0x1   :  { %v11_v0 = vld [vmem:[%s121_s0] sm:$0xff]  ;;  %v12_v1 = vld [vmem:[%s121_s0 + $0x8] sm:$0xff]  ;;  %v13_v2 = vld [vmem:[%s121_s0 + $0x10] sm:$0xff] }
   0x2   :  { %v14_v3 = vld [vmem:[%s121_s0 + $0x18] sm:$0xff]  ;;  %v15_v4 = vld [vmem:[%s121_s0 + $0x20] sm:$0xff]  ;;  %v20_v6 = vld [vmem:[%s122_s1 + $0x8] sm:$0xff] }
   0x3   :  { %v19_v5 = vld [vmem:[%s122_s1] sm:$0xff]  ;;  %v21_v7 = vld [vmem:[%s122_s1 + $0x10] sm:$0xff]  ;;  %v22_v8 = vld [vmem:[%s122_s1 + $0x18] sm:$0xff]  ;;  %v28_v11 = vsub.f32 %v12_v1, %v20_v6 }
   0x4   :  { %v27_v9 = vsub.f32 %v11_v0, %v19_v5  ;;  %v23_v10 = vld [vmem:[%s122_s1 + $0x20] sm:$0xff]  ;;  %v29_v12 = vsub.f32 %v13_v2, %v21_v7  ;;  %v30_v13 = vsub.f32 %v14_v3, %v22_v8  ;;  %v16_v14 = vld [vmem:[%s121_s0 + $0x28] sm:$0xff]  ;;  %v17_v20 = vld [vmem:[%s121_s0 + $0x30] sm:$0xff] }
   0x5   :  { %v24_v15 = vld [vmem:[%s122_s1 + $0x28] sm:$0xff]  ;;  %v31_v17 = vsub.f32 %v15_v4, %v23_v10  ;;  %v36_v18 = vmul.f32 %v28_v11, %v28_v11  ;;  %v25_v21 = vld [vmem:[%s122_s1 + $0x30] sm:$0xff]  ;;  %v18_v25 = vld [vmem:[%s121_s0 + $0x38] sm:$0xff] }
   0x6   :  { %v35_v16 = vmul.f32 %v27_v9, %v27_v9  ;;  %v37_v19 = vmul.f32 %v29_v12, %v29_v12  ;;  %v32_v22 = vsub.f32 %v16_v14, %v24_v15  ;;  %v38_v23 = vmul.f32 %v30_v13, %v30_v13  ;;  %v26_v26 = vld [vmem:[%s122_s1 + $0x38] sm:$0xff] }
   0x7   :  { %v33_v27 = vsub.f32 %v17_v20, %v25_v21  ;;  %v39_v28 = vmul.f32 %v31_v17, %v31_v17  ;;  %v34_v30 = vsub.f32 %v18_v25, %v26_v26 }
   0x8   :  { %v43_v24 = vadd.f32 %v36_v18, %v35_v16  ;;  %v40_v31 = vmul.f32 %v32_v22, %v32_v22 }
   0x9   :  { %v41_v33 = vmul.f32 %v33_v27, %v33_v27  ;;  %v42_v35 = vmul.f32 %v34_v30, %v34_v30 }
   0xa   :  { %v44_v29 = vadd.f32 %v43_v24, %v37_v19 }
   0xc   :  { %v45_v32 = vadd.f32 %v44_v29, %v38_v23 }
   0xe   :  { %v46_v34 = vadd.f32 %v45_v32, %v39_v28 }
  0x10   :  { %v47_v36 = vadd.f32 %v46_v34, %v40_v31 }
  0x12   :  { %v48_v37 = vadd.f32 %v47_v36, %v41_v33 }
  0x14   :  { %v49_v38 = vadd.f32 %v48_v37, %v42_v35 }
  0x16   :  { %50 = vst [vmem:[%s123_s2] sm:$0xff] %v49_v38 }

</bundles_post_ra>
